<compile_context>
chip_gen: v6e
topology: v6e:2x2x1
jax: 0.10.0
libtpu: 0.0.40
codegen_flags: <defaults>
</compile_context>

<pallas_src>
import jax
import jax.numpy as jnp
from jax import lax
from jax.experimental import pallas as pl
from jax.experimental.pallas import tpu as pltpu


def mlp_kernel(x_ref,
               w1_ref, b1_ref,
               w2_ref, b2_ref,
               w6_ref, b6_ref,
               w7_ref, b7_ref,
               o_ref):
    # x_ref: (tb, 11) -- batch rows as they sit in HBM (no wrapper transpose).
    x = x_ref[...]

    # h1 = relu(W1 @ x^T + b1): contract x's feature dim in place -> (16, tb), batch on lanes.
    h = lax.dot_general(w1_ref[...], x, (((1,), (1,)), ((), ())),
                        preferred_element_type=jnp.float32)
    h = jnp.maximum(h + b1_ref[...], 0.0)                                     # (16, tb)

    h = jnp.maximum(jnp.dot(w2_ref[...], h,
                            preferred_element_type=jnp.float32) + b2_ref[...], 0.0)  # (32, tb)
    h = jnp.maximum(jnp.dot(w6_ref[...], h,
                            preferred_element_type=jnp.float32) + b6_ref[...], 0.0)  # (16, tb)

    # Final layer: one small in-kernel transpose (XLU) so the output lands as (tb, 6)
    # and needs no wrapper-side transpose/HBM pass.
    ht = h.T                                                                   # (tb, 16)
    out = lax.dot_general(ht, w7_ref[...], (((1,), (1,)), ((), ())),
                          preferred_element_type=jnp.float32)                  # (tb, 6)
    out = jnp.maximum(out + b7_ref[...], 0.0)
    o_ref[...] = out.astype(o_ref.dtype)


def mlp_forward(x, params, *, block_b=4096, use_bf16=False):
    """x: (B, 11) float32.  params: PyTorch-layout (out, in) weights and (out,) biases."""
    w1, b1, w2, b2, w6, b6, w7, b7 = params
    B, in_dim = x.shape
    out_dim = w7.shape[0]

    # Bias layouts that broadcast cheaply in the kernel's (features, batch) layout.
    b1c = b1.reshape(-1, 1)      # (16, 1) -> broadcasts over lanes
    b2c = b2.reshape(-1, 1)      # (32, 1)
    b6c = b6.reshape(-1, 1)      # (16, 1)
    b7r = b7.reshape(1, -1)      # (1, 6)  -> broadcasts over sublanes for the (tb, 6) output

    if use_bf16:
        # Halves the dominant HBM read of x; MXU accumulates in f32 (bias/ReLU stay f32).
        x = x.astype(jnp.bfloat16)
        w1, w2, w6, w7 = (w.astype(jnp.bfloat16) for w in (w1, w2, w6, w7))

    # Tile selection: single grid step for small/medium B (removes all per-step overhead),
    # otherwise large lane-aligned batch tiles.
    if B <= block_b:
        tb = B
    else:
        tb = max(128, (block_b // 128) * 128)
    grid = (pl.cdiv(B, tb),)

    const = lambda i: (0, 0)
    out = pl.pallas_call(
        mlp_kernel,
        out_shape=jax.ShapeDtypeStruct((B, out_dim), jnp.float32),
        grid=grid,
        in_specs=[
            pl.BlockSpec((tb, in_dim), lambda i: (i, 0)),   # x, streamed over the batch
            pl.BlockSpec((16, 11), const),                  # w1 (VMEM-resident)
            pl.BlockSpec((16, 1),  const),                  # b1
            pl.BlockSpec((32, 16), const),                  # w2
            pl.BlockSpec((32, 1),  const),                  # b2
            pl.BlockSpec((16, 32), const),                  # w6
            pl.BlockSpec((16, 1),  const),                  # b6
            pl.BlockSpec((6, 16),  const),                  # w7
            pl.BlockSpec((1, 6),   const),                  # b7 (row layout)
        ],
        out_specs=pl.BlockSpec((tb, out_dim), lambda i: (i, 0)),
        compiler_params=pltpu.CompilerParams(
            dimension_semantics=("parallel",)),             # batch axis shards across cores
    )(x, w1, b1c, w2, b2c, w6, b6c, w7, b7r)
    return out


def init_params(key):
    # PyTorch nn.Linear layout: W is (out, in), bias is (out,).
    dims = [(16, 11), (32, 16), (16, 32), (6, 16)]  # fc1, fc2, fc6, fc7
    params = []
    for fan_out, fan_in in dims:
        kw, kb, key = jax.random.split(key, 3)
        bound = 1.0 / jnp.sqrt(fan_in)
        w = jax.random.uniform(kw, (fan_out, fan_in), jnp.float32, -bound, bound)
        b = jax.random.uniform(kb, (fan_out,), jnp.float32, -bound, bound)
        params += [w, b]
    return tuple(params)


def reference_forward(x, params):
    w1, b1, w2, b2, w6, b6, w7, b7 = params
    h = jnp.maximum(x @ w1.T + b1, 0.0)
    h = jnp.maximum(h @ w2.T + b2, 0.0)
    h = jnp.maximum(h @ w6.T + b6, 0.0)
    h = jnp.maximum(h @ w7.T + b7, 0.0)
    return h


if __name__ == "__main__":
    key = jax.random.PRNGKey(0)
    kx, kp = jax.random.split(key)

    B = 256
    x = jax.random.normal(kx, (B, 11), jnp.float32)
    params = init_params(kp)
    ref = reference_forward(x, params)

    # Default path: single grid step (tb == B), no per-step overhead.
    fwd_single = jax.jit(lambda xx: mlp_forward(xx, params))
    out_single = jax.block_until_ready(fwd_single(x))

    # Multi-step path: exercises the batch grid / double-buffered pipeline.
    fwd_tiled = jax.jit(lambda xx: mlp_forward(xx, params, block_b=128))
    out_tiled = jax.block_until_ready(fwd_tiled(x))

    assert out_single.shape == (B, 6) and out_tiled.shape == (B, 6)
    assert jnp.allclose(out_single, ref, atol=1e-5, rtol=1e-5), "single-step mismatch vs reference"
    assert jnp.allclose(out_tiled, ref, atol=1e-5, rtol=1e-5), "tiled mismatch vs reference"

    print("KERNEL_OK")
</pallas_src>

<mosaic_0001>
module attributes {stable_mosaic.version = 11 : i64} {
  func.func @mlp_kernel(%arg0: i32, %arg1: memref<256x11xf32, #tpu.memory_space<vmem>>, %arg2: memref<16x11xf32, #tpu.memory_space<vmem>>, %arg3: memref<16x1xf32, #tpu.memory_space<vmem>>, %arg4: memref<32x16xf32, #tpu.memory_space<vmem>>, %arg5: memref<32x1xf32, #tpu.memory_space<vmem>>, %arg6: memref<16x32xf32, #tpu.memory_space<vmem>>, %arg7: memref<16x1xf32, #tpu.memory_space<vmem>>, %arg8: memref<6x16xf32, #tpu.memory_space<vmem>>, %arg9: memref<1x6xf32, #tpu.memory_space<vmem>>, %arg10: memref<256x6xf32, #tpu.memory_space<vmem>>) attributes {dimension_semantics = [#tpu.dimension_semantics<parallel>], iteration_bounds = array<i64: 1>, scalar_prefetch = 0 : i64, scratch_operands = 0 : i64, tpu.core_type = #tpu.core_type<tc>, window_params = [{transform_indices = @transform_0, window_bounds = array<i64: 256, 11>}, {pipeline_mode = #tpu.pipeline_mode<synchronous>, transform_indices = @transform_1, window_bounds = array<i64: 16, 11>}, {pipeline_mode = #tpu.pipeline_mode<synchronous>, transform_indices = @transform_2, window_bounds = array<i64: 16, 1>}, {pipeline_mode = #tpu.pipeline_mode<synchronous>, transform_indices = @transform_3, window_bounds = array<i64: 32, 16>}, {pipeline_mode = #tpu.pipeline_mode<synchronous>, transform_indices = @transform_4, window_bounds = array<i64: 32, 1>}, {pipeline_mode = #tpu.pipeline_mode<synchronous>, transform_indices = @transform_5, window_bounds = array<i64: 16, 32>}, {pipeline_mode = #tpu.pipeline_mode<synchronous>, transform_indices = @transform_6, window_bounds = array<i64: 16, 1>}, {pipeline_mode = #tpu.pipeline_mode<synchronous>, transform_indices = @transform_7, window_bounds = array<i64: 6, 16>}, {pipeline_mode = #tpu.pipeline_mode<synchronous>, transform_indices = @transform_8, window_bounds = array<i64: 1, 6>}, {transform_indices = @transform_9, window_bounds = array<i64: 256, 6>}]} {
    %c0 = arith.constant 0 : index
    %c0_0 = arith.constant 0 : index
    %0 = vector.load %arg1[%c0, %c0_0] : memref<256x11xf32, #tpu.memory_space<vmem>>, vector<256x11xf32>
    %c0_1 = arith.constant 0 : index
    %c0_2 = arith.constant 0 : index
    %1 = vector.load %arg2[%c0_1, %c0_2] : memref<16x11xf32, #tpu.memory_space<vmem>>, vector<16x11xf32>
    %cst = arith.constant dense<0.000000e+00> : vector<16x256xf32>
    %2 = tpu.matmul %1, %0, %cst {dimension_numbers = #tpu.dot_dimension_numbers<[1], [1], [0], [0], [0, 0, 1, 0], [], []>} : vector<16x11xf32>, vector<256x11xf32>, vector<16x256xf32> -> vector<16x256xf32>
    %c0_3 = arith.constant 0 : index
    %c0_4 = arith.constant 0 : index
    %3 = vector.load %arg3[%c0_3, %c0_4] : memref<16x1xf32, #tpu.memory_space<vmem>>, vector<16x1xf32>
    %4 = vector.broadcast %3 : vector<16x1xf32> to vector<16x256xf32>
    %5 = arith.addf %2, %4 : vector<16x256xf32>
    %cst_5 = arith.constant 0.000000e+00 : f32
    %6 = vector.broadcast %cst_5 : f32 to vector<16x256xf32>
    %7 = arith.maximumf %5, %6 : vector<16x256xf32>
    %c0_6 = arith.constant 0 : index
    %c0_7 = arith.constant 0 : index
    %8 = vector.load %arg4[%c0_6, %c0_7] : memref<32x16xf32, #tpu.memory_space<vmem>>, vector<32x16xf32>
    %cst_8 = arith.constant dense<0.000000e+00> : vector<32x256xf32>
    %9 = tpu.matmul %8, %7, %cst_8 {dimension_numbers = #tpu.dot_dimension_numbers<[1], [0], [0], [1], [0, 0, 1, 1], [], []>} : vector<32x16xf32>, vector<16x256xf32>, vector<32x256xf32> -> vector<32x256xf32>
    %c0_9 = arith.constant 0 : index
    %c0_10 = arith.constant 0 : index
    %10 = vector.load %arg5[%c0_9, %c0_10] : memref<32x1xf32, #tpu.memory_space<vmem>>, vector<32x1xf32>
    %11 = vector.broadcast %10 : vector<32x1xf32> to vector<32x256xf32>
    %12 = arith.addf %9, %11 : vector<32x256xf32>
    %cst_11 = arith.constant 0.000000e+00 : f32
    %13 = vector.broadcast %cst_11 : f32 to vector<32x256xf32>
    %14 = arith.maximumf %12, %13 : vector<32x256xf32>
    %c0_12 = arith.constant 0 : index
    %c0_13 = arith.constant 0 : index
    %15 = vector.load %arg6[%c0_12, %c0_13] : memref<16x32xf32, #tpu.memory_space<vmem>>, vector<16x32xf32>
    %cst_14 = arith.constant dense<0.000000e+00> : vector<16x256xf32>
    %16 = tpu.matmul %15, %14, %cst_14 {dimension_numbers = #tpu.dot_dimension_numbers<[1], [0], [0], [1], [0, 0, 1, 1], [], []>} : vector<16x32xf32>, vector<32x256xf32>, vector<16x256xf32> -> vector<16x256xf32>
    %c0_15 = arith.constant 0 : index
    %c0_16 = arith.constant 0 : index
    %17 = vector.load %arg7[%c0_15, %c0_16] : memref<16x1xf32, #tpu.memory_space<vmem>>, vector<16x1xf32>
    %18 = vector.broadcast %17 : vector<16x1xf32> to vector<16x256xf32>
    %19 = arith.addf %16, %18 : vector<16x256xf32>
    %cst_17 = arith.constant 0.000000e+00 : f32
    %20 = vector.broadcast %cst_17 : f32 to vector<16x256xf32>
    %21 = arith.maximumf %19, %20 : vector<16x256xf32>
    %22 = tpu.transpose %21, [1, 0] : vector<16x256xf32> -> vector<256x16xf32>
    %c0_18 = arith.constant 0 : index
    %c0_19 = arith.constant 0 : index
    %23 = vector.load %arg8[%c0_18, %c0_19] : memref<6x16xf32, #tpu.memory_space<vmem>>, vector<6x16xf32>
    %cst_20 = arith.constant dense<0.000000e+00> : vector<256x6xf32>
    %24 = tpu.matmul %22, %23, %cst_20 {dimension_numbers = #tpu.dot_dimension_numbers<[1], [1], [0], [0], [0, 0, 1, 0], [], []>} : vector<256x16xf32>, vector<6x16xf32>, vector<256x6xf32> -> vector<256x6xf32>
    %c0_21 = arith.constant 0 : index
    %c0_22 = arith.constant 0 : index
    %25 = vector.load %arg9[%c0_21, %c0_22] : memref<1x6xf32, #tpu.memory_space<vmem>>, vector<1x6xf32>
    %26 = vector.broadcast %25 : vector<1x6xf32> to vector<256x6xf32>
    %27 = arith.addf %24, %26 : vector<256x6xf32>
    %cst_23 = arith.constant 0.000000e+00 : f32
    %28 = vector.broadcast %cst_23 : f32 to vector<256x6xf32>
    %29 = arith.maximumf %27, %28 : vector<256x6xf32>
    %c0_24 = arith.constant 0 : index
    %c0_25 = arith.constant 0 : index
    %30 = vector.load %arg10[%c0_24, %c0_25] : memref<256x6xf32, #tpu.memory_space<vmem>>, vector<256x6xf32>
    tpu.vector_store %arg10[%c0_24, %c0_25], %29 {strides = array<i32>} : memref<256x6xf32, #tpu.memory_space<vmem>>, vector<256x6xf32>,
    return
  }
  func.func @transform_0(%arg0: i32) -> (i32, i32) {
    %c0_i32 = arith.constant 0 : i32
    %c0_i32_0 = arith.constant 0 : i32
    return %arg0, %c0_i32 : i32, i32
  }
  func.func @transform_1(%arg0: i32) -> (i32, i32) {
    %c0_i32 = arith.constant 0 : i32
    %c0_i32_0 = arith.constant 0 : i32
    %c0_i32_1 = arith.constant 0 : i32
    return %c0_i32, %c0_i32_0 : i32, i32
  }
  func.func @transform_2(%arg0: i32) -> (i32, i32) {
    %c0_i32 = arith.constant 0 : i32
    %c0_i32_0 = arith.constant 0 : i32
    %c0_i32_1 = arith.constant 0 : i32
    return %c0_i32, %c0_i32_0 : i32, i32
  }
  func.func @transform_3(%arg0: i32) -> (i32, i32) {
    %c0_i32 = arith.constant 0 : i32
    %c0_i32_0 = arith.constant 0 : i32
    %c0_i32_1 = arith.constant 0 : i32
    return %c0_i32, %c0_i32_0 : i32, i32
  }
  func.func @transform_4(%arg0: i32) -> (i32, i32) {
    %c0_i32 = arith.constant 0 : i32
    %c0_i32_0 = arith.constant 0 : i32
    %c0_i32_1 = arith.constant 0 : i32
    return %c0_i32, %c0_i32_0 : i32, i32
  }
  func.func @transform_5(%arg0: i32) -> (i32, i32) {
    %c0_i32 = arith.constant 0 : i32
    %c0_i32_0 = arith.constant 0 : i32
    %c0_i32_1 = arith.constant 0 : i32
    return %c0_i32, %c0_i32_0 : i32, i32
  }
  func.func @transform_6(%arg0: i32) -> (i32, i32) {
    %c0_i32 = arith.constant 0 : i32
    %c0_i32_0 = arith.constant 0 : i32
    %c0_i32_1 = arith.constant 0 : i32
    return %c0_i32, %c0_i32_0 : i32, i32
  }
  func.func @transform_7(%arg0: i32) -> (i32, i32) {
    %c0_i32 = arith.constant 0 : i32
    %c0_i32_0 = arith.constant 0 : i32
    %c0_i32_1 = arith.constant 0 : i32
    return %c0_i32, %c0_i32_0 : i32, i32
  }
  func.func @transform_8(%arg0: i32) -> (i32, i32) {
    %c0_i32 = arith.constant 0 : i32
    %c0_i32_0 = arith.constant 0 : i32
    %c0_i32_1 = arith.constant 0 : i32
    return %c0_i32, %c0_i32_0 : i32, i32
  }
  func.func @transform_9(%arg0: i32) -> (i32, i32) {
    %c0_i32 = arith.constant 0 : i32
    %c0_i32_0 = arith.constant 0 : i32
    return %arg0, %c0_i32 : i32, i32
  }
}

</mosaic_0001>

<bundles_post_ra>
// kernel: _lambda_.1
= control target key start
LH: loop header
LB: loop body
LE: loop exit
PB: predicated region body
PF: predicated region fallthrough
CT: control target
= control target key end

     0   :  { %vm78_vm0 = vcmask 89088   ;;  %v1168_v3 = vmov 0   ;;  %v1169_v39 = vmov 0.0   ;;  %vm290_vm1 = vcmask 130048   ;;  %s1616_s0 = inlined_call_operand.vmem [shape: f32[256,11], index: 0, kind: input, shape index: {}]   ;;  %s1617_s1 = inlined_call_operand.vmem [shape: f32[16,11], index: 1, kind: input, shape index: {}]   ;;  %s1618_s2 = inlined_call_operand.vmem [shape: f32[16,1], index: 2, kind: input, shape index: {}]   ;;  %s1619_s4 = inlined_call_operand.vmem [shape: f32[32,1], index: 4, kind: input, shape index: {}]   ;;  %s1620_s6 = inlined_call_operand.vmem [shape: f32[16,1], index: 6, kind: input, shape index: {}]   ;;  %s1621_s3 = inlined_call_operand.vmem [shape: f32[32,16], index: 3, kind: input, shape index: {}]   ;;  %s1622_s5 = inlined_call_operand.vmem [shape: f32[16,32], index: 5, kind: input, shape index: {}]   ;;  %s1623_s7 = inlined_call_operand.vmem [shape: f32[6,16], index: 7, kind: input, shape index: {}]   ;;  %s1624_s8 = inlined_call_operand.vmem [shape: f32[1,6], index: 8, kind: input, shape index: {}]   ;;  %s1625_s9 = inlined_call_operand.vmem [shape: f32[256,6], index: 9, kind: output, shape index: {}]  }
   0x1   :  { %v63_v0 = vld [vmem:[%s1616_s0 + $0xf8] sm:$0xff]  ;;  %v62_v2 = vld [vmem:[%s1616_s0 + $0xf0] sm:$0xff]  ;;  %1166 = vset.pattern.permute.xlu0 %v1168_v3  ;;  %1167 = vset.pattern.permute.xlu1 %v1168_v3  ;;  %v61_v5 = vld [vmem:[%s1616_s0 + $0xe8] sm:$0xff]  ;;  %vm414_vm2 = vcmask 261120   ;;  %vm930_vm3 = vcmask 48128  }
   0x2   :  { %v47_v1 = vld [vmem:[%s1616_s0 + $0x78] sm:$0xff]  ;;  %1041 = vmatprep.subr.msk.mxu0 %vm78_vm0, %v63_v0  ;;  %v46_v4 = vld [vmem:[%s1616_s0 + $0x70] sm:$0xff]  ;;  %v45_v6 = vld [vmem:[%s1616_s0 + $0x68] sm:$0xff]  ;;  %379 = vmatprep.mubr.f32.mxu1 %v1169_v39 }
   0x3   :  { %1042 = vmatpush3.xpose.msk.msra.mxu0 %vm78_vm0, %v47_v1  ;;  %v60_v7 = vld [vmem:[%s1616_s0 + $0xe0] sm:$0xff]  ;;  %v67_v10 = vld [vmem:[%s1618_s2 + $0x8] sm:$0xff]  ;;  %v59_v11 = vld [vmem:[%s1616_s0 + $0xd8] sm:$0xff] }
   0x4   :  { %1043 = vmatprep.subr.msk.mxu0 %vm78_vm0, %v62_v2  ;;  %v1250_v8 = vld [vmem:[%s1617_s1] sm:$0xff]  ;;  %75 = vperm.xlu0 %1166, %v67_v10   ;;  %v43_v13 = vld [vmem:[%s1616_s0 + $0x58] sm:$0xff]  ;;  %v58_v14 = vld [vmem:[%s1616_s0 + $0xd0] sm:$0xff] }
   0x5   :  { %v44_v9 = vld [vmem:[%s1616_s0 + $0x60] sm:$0xff]  ;;  %1073 = vmatprep.mubr.msk.f32.mxu0 %vm78_vm0, %v1250_v8  ;;  %v267_v15 = vld [vmem:[%s1619_s4 + $0x8] sm:$0xff]  ;;  %v42_v16 = vld [vmem:[%s1616_s0 + $0x50] sm:$0xff] }
   0x6   :  { %v66_v12 = vld [vmem:[%s1618_s2] sm:$0xff]  ;;  %v57_v17 = vld [vmem:[%s1616_s0 + $0xc8] sm:$0xff]  ;;  %v55_v22 = vld [vmem:[%s1616_s0 + $0xb8] sm:$0xff] }
   0x7   :  { %1044 = vmatpush3.xpose.msk.msra.mxu0 %vm78_vm0, %v46_v4  ;;  %v402_v18 = vld [vmem:[%s1620_s6] sm:$0xff]  ;;  %v41_v19 = vld [vmem:[%s1616_s0 + $0x48] sm:$0xff]  ;;  %v39_v23 = vld [vmem:[%s1616_s0 + $0x38] sm:$0xff] }
   0x8   :  { %1045 = vmatprep.subr.msk.mxu0 %vm78_vm0, %v61_v5  ;;  %70 = vperm.xlu0 %1166, %v66_v12   ;;  %v56_v20 = vld [vmem:[%s1616_s0 + $0xc0] sm:$0xff]  ;;  %v54_v24 = vld [vmem:[%s1616_s0 + $0xb0] sm:$0xff]  ;;  %v53_v26 = vld [vmem:[%s1616_s0 + $0xa8] sm:$0xff] }
   0x9   :  { %v40_v21 = vld [vmem:[%s1616_s0 + $0x40] sm:$0xff]  ;;  %v38_v25 = vld [vmem:[%s1616_s0 + $0x30] sm:$0xff]  ;;  %v37_v27 = vld [vmem:[%s1616_s0 + $0x28] sm:$0xff] }
   0xa   :  { %v52_v28 = vld [vmem:[%s1616_s0 + $0xa0] sm:$0xff]  ;;  %v51_v30 = vld [vmem:[%s1616_s0 + $0x98] sm:$0xff]  ;;  %v50_v32 = vld [vmem:[%s1616_s0 + $0x90] sm:$0xff] }
   0xb   :  { %1046 = vmatpush3.xpose.msk.msra.mxu0 %vm78_vm0, %v45_v6  ;;  %v36_v29 = vld [vmem:[%s1616_s0 + $0x20] sm:$0xff]  ;;  %v35_v31 = vld [vmem:[%s1616_s0 + $0x18] sm:$0xff]  ;;  %v34_v33 = vld [vmem:[%s1616_s0 + $0x10] sm:$0xff] }
   0xc   :  { %1047 = vmatprep.subr.msk.mxu0 %vm78_vm0, %v60_v7  ;;  %277 = vperm.xlu0 %1166, %v267_v15   ;;  %v49_v34 = vld [vmem:[%s1616_s0 + $0x88] sm:$0xff]  ;;  %v48_v36 = vld [vmem:[%s1616_s0 + $0x80] sm:$0xff]  ;;  %v269_v40 = vld [vmem:[%s1619_s4 + $0x18] sm:$0xff] }
   0xd   :  { %v33_v35 = vld [vmem:[%s1616_s0 + $0x8] sm:$0xff]  ;;  %v32_v37 = vld [vmem:[%s1616_s0] sm:$0xff]  ;;  %287 = vperm.xlu1 %1167, %v269_v40   ;;  %v268_v41 = vld [vmem:[%s1619_s4 + $0x10] sm:$0xff] }
   0xe   :  { %v65_v38 = vld [vmem:[%s1617_s1 + $0x8] sm:$0xff]  ;;  %v266_v42 = vld [vmem:[%s1619_s4] sm:$0xff]  ;;  %v264_v59 = vld [vmem:[%s1621_s3 + $0x10] sm:$0xff] }
   0xf   :  { %1048 = vmatpush3.xpose.msk.msra.mxu0 %vm78_vm0, %v44_v9  ;;  %v403_v43 = vld [vmem:[%s1620_s6 + $0x8] sm:$0xff]  ;;  %v262_v58 = vld [vmem:[%s1621_s3] sm:$0xff]  ;;  %v265_v61 = vld [vmem:[%s1621_s3 + $0x18] sm:$0xff] }
  0x10   :  { %1049 = vmatprep.subr.msk.mxu0 %vm78_vm0, %v59_v11  ;;  %406 = vperm.xlu0 %1166, %v402_v18   ;;  %v263_v60 = vld [vmem:[%s1621_s3 + $0x8] sm:$0xff] }
  0x11   :  { %282 = vperm.xlu1 %1167, %v268_v41  }
  0x13   :  { %1050 = vmatpush3.xpose.msk.msra.mxu0 %vm78_vm0, %v43_v13 }
  0x14   :  { %1051 = vmatprep.subr.msk.mxu0 %vm78_vm0, %v58_v14 }
  0x15   :  { %272 = vperm.xlu1 %1167, %v266_v42  }
  0x17   :  { %1052 = vmatpush3.xpose.msk.msra.mxu0 %vm78_vm0, %v42_v16 }
  0x18   :  { %1053 = vmatprep.subr.msk.mxu0 %vm78_vm0, %v57_v17 }
  0x19   :  { %411 = vperm.xlu1 %1167, %v403_v43  }
  0x1b   :  { %1054 = vmatpush3.xpose.msk.msra.mxu0 %vm78_vm0, %v41_v19 }
  0x1c   :  { %1055 = vmatprep.subr.msk.mxu0 %vm78_vm0, %v56_v20 }
  0x1f   :  { %1056 = vmatpush3.xpose.msk.msra.mxu0 %vm78_vm0, %v40_v21 }
  0x20   :  { %1057 = vmatprep.subr.msk.mxu0 %vm78_vm0, %v55_v22 }
  0x23   :  { %1058 = vmatpush3.xpose.msk.msra.mxu0 %vm78_vm0, %v39_v23 }
  0x24   :  { %1059 = vmatprep.subr.msk.mxu0 %vm78_vm0, %v54_v24 }
  0x27   :  { %1060 = vmatpush3.xpose.msk.msra.mxu0 %vm78_vm0, %v38_v25 }
  0x28   :  { %1061 = vmatprep.subr.msk.mxu0 %vm78_vm0, %v53_v26  ;;  %v400_v26 = vld [vmem:[%s1622_s5] sm:$0xff] }
  0x2b   :  { %1062 = vmatpush3.xpose.msk.msra.mxu0 %vm78_vm0, %v37_v27  ;;  %v401_v27 = vld [vmem:[%s1622_s5 + $0x8] sm:$0xff] }
  0x2c   :  { %1063 = vmatprep.subr.msk.mxu0 %vm78_vm0, %v52_v28 }
  0x2f   :  { %1064 = vmatpush3.xpose.msk.msra.mxu0 %vm78_vm0, %v36_v29 }
  0x30   :  { %1065 = vmatprep.subr.msk.mxu0 %vm78_vm0, %v51_v30 }
  0x33   :  { %1066 = vmatpush3.xpose.msk.msra.mxu0 %vm78_vm0, %v35_v31  ;;  %v566_v31 = vld [vmem:[%s1623_s7] sm:$0x3f] }
  0x34   :  { %1067 = vmatprep.subr.msk.mxu0 %vm78_vm0, %v50_v32 }
  0x37   :  { %1068 = vmatpush3.xpose.msk.msra.mxu0 %vm78_vm0, %v34_v33 }
  0x38   :  { %1069 = vmatprep.subr.msk.mxu0 %vm78_vm0, %v49_v34 }
  0x3b   :  { %1070 = vmatpush3.xpose.msk.msra.mxu0 %vm78_vm0, %v33_v35 }
  0x3c   :  { %1071 = vmatprep.subr.msk.mxu0 %vm78_vm0, %v48_v36 }
  0x3f   :  { %1072 = vmatpush3.xpose.msk.msra.mxu0 %vm78_vm0, %v32_v37 }
  0x42   :  { %1074 = vmatmul.mubr.msk.f32.vlgmr.msra.gmra.mxu0 %vm78_vm0, %v1250_v8 }
  0x43   :  { %1075 = vmatprep.mubr.msk.f32.mxu0 %vm78_vm0, %v65_v38 }
  0x46   :  { %1076 = vmatmul.mubr.msk.f32.gmra.mxu0 %vm78_vm0, %v65_v38 }
  0x47   :  { %367 = vmatprep.mubr.f32.mxu0 %v1169_v39 }
  0x7f   :  { %v76_v44 = vpop.permute.xlu0 %75 }
  0x83   :  { %v71_v48 = vpop.permute.xlu0 %70 }
  0x87   :  { %v278_v11 = vpop.permute.xlu0 %277 }
  0x88   :  { %v288_v62 = vpop.permute.xlu1 %287 }
  0x8b   :  { %v407_v28 = vpop.permute.xlu0 %406 }
  0x8c   :  { %v283_v3 = vpop.permute.xlu1 %282 }
  0x90   :  { %v273_v15 = vpop.permute.xlu1 %272 }
  0x94   :  { %v412_v35 = vpop.permute.xlu1 %411 }
 0x102   :  { %v247_v45 = vpop.f32.mrf.mxu0 }
 0x103   :  { %v248_v53 = vadd.f32 %v247_v45, %v71_v48 }
 0x104   :  { %v249_v46 = vpop.f32.mrf.mxu0 }
 0x105   :  { %v250_v51 = vadd.f32 %v249_v46, %v71_v48  ;;  %v258_v57 = vmax.f32 %v248_v53, 0.0 }
 0x106   :  { %v253_v47 = vpop.f32.mrf.mxu0 }
 0x107   :  { %v254_v49 = vadd.f32 %v253_v47, %v76_v44  ;;  %v259_v56 = vmax.f32 %v250_v51, 0.0 }
 0x108   :  { %v255_v50 = vpop.f32.mrf.mxu0 }
 0x109   :  { %v256_v52 = vadd.f32 %v255_v50, %v76_v44  ;;  %v260_v55 = vmax.f32 %v254_v49, 0.0 }
 0x10b   :  { %v261_v54 = vmax.f32 %v256_v52, 0.0 }
 0x10d   :  { %331 = vmatprep.subr.mxu0 %v261_v54  ;;  %1160 = vmatprep.subr.mxu1 %v261_v54 }
 0x10e   :  { %332 = vmatpush1.msra.mxu0 %v260_v55  ;;  %1162 = vmatpush1.msra.mxu1 %v260_v55 }
 0x10f   :  { %333 = vmatprep.subr.mxu0 %v259_v56  ;;  %1161 = vmatprep.subr.mxu1 %v259_v56 }
 0x110   :  { %334 = vmatpush1.msra.mxu0 %v258_v57  ;;  %1163 = vmatpush1.msra.mxu1 %v258_v57 }
 0x111   :  { %1001 = vmatmul.mubr.msk.f32.vlgmr.msra.gmra.mxu0 %vm290_vm1, %v262_v58  ;;  %1003 = vmatmul.mubr.msk.f32.vlgmr.msra.gmra.mxu1 %vm290_vm1, %v264_v59 }
 0x112   :  { %373 = vmatprep.mubr.f32.mxu0 %v1169_v39  ;;  %385 = vmatprep.mubr.f32.mxu1 %v1169_v39 }
 0x115   :  { %1002 = vmatmul.mubr.msk.f32.gmra.mxu0 %vm290_vm1, %v263_v60  ;;  %1004 = vmatmul.mubr.msk.f32.gmra.mxu1 %vm290_vm1, %v265_v61 }
 0x116   :  { %485 = vmatprep.mubr.f32.mxu1 %v1169_v39 }
 0x1d1   :  { %v369_v63 = vpop.f32.mrf.mxu0  ;;  %v381_v0 = vpop.f32.mrf.mxu1 }
 0x1d2   :  { %v382_v12 = vadd.f32 %v381_v0, %v283_v3  ;;  %v370_v20 = vadd.f32 %v369_v63, %v273_v15 }
 0x1d3   :  { %v371_v1 = vpop.f32.mrf.mxu0  ;;  %v383_v2 = vpop.f32.mrf.mxu1 }
 0x1d4   :  { %v384_v9 = vadd.f32 %v383_v2, %v283_v3  ;;  %v372_v18 = vadd.f32 %v371_v1, %v273_v15  ;;  %v396_v21 = vmax.f32 %v382_v12, 0.0  ;;  %v392_v25 = vmax.f32 %v370_v20, 0.0 }
 0x1d5   :  { %v375_v4 = vpop.f32.mrf.mxu0  ;;  %v387_v5 = vpop.f32.mrf.mxu1 }
 0x1d6   :  { %v388_v6 = vadd.f32 %v387_v5, %v288_v62  ;;  %v376_v16 = vadd.f32 %v375_v4, %v278_v11  ;;  %v397_v19 = vmax.f32 %v384_v9, 0.0  ;;  %v393_v24 = vmax.f32 %v372_v18, 0.0 }
 0x1d7   :  { %v377_v7 = vpop.f32.mrf.mxu0  ;;  %v389_v8 = vpop.f32.mrf.mxu1 }
 0x1d8   :  { %v390_v10 = vadd.f32 %v389_v8, %v288_v62  ;;  %v378_v13 = vadd.f32 %v377_v7, %v278_v11  ;;  %v398_v17 = vmax.f32 %v388_v6, 0.0  ;;  %v394_v23 = vmax.f32 %v376_v16, 0.0  ;;  %v1454_v11 = vld [vmem:[%s1624_s8] ss:$0 sm:$0xff] }
 0x1da   :  { %v399_v14 = vmax.f32 %v390_v10, 0.0  ;;  %v395_v22 = vmax.f32 %v378_v13, 0.0 }
 0x1dc   :  { %445 = vmatprep.subr.mxu1 %v399_v14 }
 0x1dd   :  { %446 = vmatpush1.msra.mxu1 %v398_v17 }
 0x1de   :  { %447 = vmatprep.subr.mxu1 %v397_v19 }
 0x1df   :  { %448 = vmatpush1.msra.mxu1 %v396_v21 }
 0x1e0   :  { %449 = vmatprep.subr.mxu1 %v395_v22 }
 0x1e1   :  { %450 = vmatpush1.msra.mxu1 %v394_v23 }
 0x1e2   :  { %451 = vmatprep.subr.mxu1 %v393_v24 }
 0x1e3   :  { %452 = vmatpush1.msra.mxu1 %v392_v25 }
 0x1e4   :  { %1005 = vmatmul.mubr.msk.f32.vlgmr.msra.gmra.mxu1 %vm414_vm2, %v400_v26  ;;  %1110 = vmatprep.subr.msk.mxu1 %vm290_vm1, %v566_v31 }
 0x1e5   :  { %491 = vmatprep.mubr.f32.mxu1 %v1169_v39  ;;  %1111 = vmatpush3.xpose.msk.msra.mxu1 %vm290_vm1, %v566_v31 }
 0x1e8   :  { %1006 = vmatmul.mubr.msk.f32.gmra.mxu1 %vm414_vm2, %v401_v27 }
 0x2a4   :  { %v487_v29 = vpop.f32.mrf.mxu1 }
 0x2a5   :  { %v488_v30 = vadd.f32 %v487_v29, %v407_v28 }
 0x2a6   :  { %v489_v32 = vpop.f32.mrf.mxu1 }
 0x2a7   :  { %v498_v33 = vmax.f32 %v488_v30, 0.0  ;;  %v490_v34 = vadd.f32 %v489_v32, %v407_v28 }
 0x2a8   :  { %v493_v36 = vpop.f32.mrf.mxu1 }
 0x2a9   :  { %v499_v37 = vmax.f32 %v490_v34, 0.0  ;;  %v494_v38 = vadd.f32 %v493_v36, %v412_v35  ;;  %502 = vxpose.xlu0.b32.start [1/2] (short) %v498_v33, 128 }
 0x2aa   :  { %v495_v39 = vpop.f32.mrf.mxu1 }
 0x2ab   :  { %v500_v40 = vmax.f32 %v494_v38, 0.0  ;;  %v496_v41 = vadd.f32 %v495_v39, %v412_v35  ;;  %534 = vxpose.xlu1.b32.start [1/2] (short) %v499_v37, 128 }
 0x2ad   :  { %v501_v42 = vmax.f32 %v496_v41, 0.0  ;;  %503 = vxpose.xlu0.b32.end [2/2] (short) %v500_v40, 128 }
 0x2af   :  { %535 = vxpose.xlu1.b32.end [2/2] (short) %v501_v42, 128 }
 0x325   :  { %v518_v43 = vpop.trf.xlu0 }
 0x326   :  { %1112 = vmatprep.mubr.msk.f32.mxu1 %vm290_vm1, %v518_v43 }
 0x327   :  { %v550_v44 = vpop.trf.xlu1 }
 0x329   :  { %v519_v45 = vpop.trf.xlu0 }
 0x32a   :  { %1113 = vmatmul.mubr.msk.f32.vlgmr.msra.gmra.mxu1 %vm290_vm1, %v519_v45 }
 0x32b   :  { %v551_v46 = vpop.trf.xlu1 }
 0x32d   :  { %v520_v47 = vpop.trf.xlu0 }
 0x32e   :  { %1115 = vmatprep.mubr.msk.f32.mxu1 %vm290_vm1, %v520_v47 }
 0x32f   :  { %v552_v49 = vpop.trf.xlu1 }
 0x331   :  { %v521_v48 = vpop.trf.xlu0 }
 0x332   :  { %1116 = vmatmul.mubr.msk.f32.gmra.mxu1 %vm290_vm1, %v521_v48 }
 0x333   :  { %v553_v51 = vpop.trf.xlu1 }
 0x335   :  { %v522_v50 = vpop.trf.xlu0 }
 0x336   :  { %1118 = vmatprep.mubr.msk.f32.mxu1 %vm290_vm1, %v522_v50 }
 0x337   :  { %v554_v54 = vpop.trf.xlu1 }
 0x339   :  { %v523_v52 = vpop.trf.xlu0 }
 0x33a   :  { %1119 = vmatmul.mubr.msk.f32.gmra.mxu1 %vm290_vm1, %v523_v52 }
 0x33b   :  { %v555_v56 = vpop.trf.xlu1 }
 0x33d   :  { %v524_v53 = vpop.trf.xlu0 }
 0x33e   :  { %1121 = vmatprep.mubr.msk.f32.mxu1 %vm290_vm1, %v524_v53 }
 0x33f   :  { %v556_v59 = vpop.trf.xlu1 }
 0x341   :  { %v525_v55 = vpop.trf.xlu0 }
 0x342   :  { %1122 = vmatmul.mubr.msk.f32.gmra.mxu1 %vm290_vm1, %v525_v55 }
 0x343   :  { %v557_v61 = vpop.trf.xlu1 }
 0x345   :  { %v526_v57 = vpop.trf.xlu0 }
 0x346   :  { %1124 = vmatprep.mubr.msk.f32.mxu1 %vm290_vm1, %v526_v57 }
 0x347   :  { %v558_v0 = vpop.trf.xlu1 }
 0x349   :  { %v527_v58 = vpop.trf.xlu0 }
 0x34a   :  { %1125 = vmatmul.mubr.msk.f32.gmra.mxu1 %vm290_vm1, %v527_v58 }
 0x34b   :  { %v559_v2 = vpop.trf.xlu1 }
 0x34d   :  { %v528_v60 = vpop.trf.xlu0 }
 0x34e   :  { %1127 = vmatprep.mubr.msk.f32.mxu1 %vm290_vm1, %v528_v60 }
 0x34f   :  { %v560_v5 = vpop.trf.xlu1 }
 0x351   :  { %v529_v62 = vpop.trf.xlu0 }
 0x352   :  { %1128 = vmatmul.mubr.msk.f32.gmra.mxu1 %vm290_vm1, %v529_v62 }
 0x353   :  { %v561_v6 = vpop.trf.xlu1 }
 0x355   :  { %v530_v63 = vpop.trf.xlu0 }
 0x356   :  { %1130 = vmatprep.mubr.msk.f32.mxu1 %vm290_vm1, %v530_v63 }
 0x357   :  { %v562_v7 = vpop.trf.xlu1 }
 0x359   :  { %v531_v1 = vpop.trf.xlu0 }
 0x35a   :  { %1131 = vmatmul.mubr.msk.f32.gmra.mxu1 %vm290_vm1, %v531_v1 }
 0x35b   :  { %v563_v8 = vpop.trf.xlu1 }
 0x35d   :  { %v532_v3 = vpop.trf.xlu0 }
 0x35e   :  { %1133 = vmatprep.mubr.msk.f32.mxu1 %vm290_vm1, %v532_v3 }
 0x35f   :  { %v564_v9 = vpop.trf.xlu1 }
 0x361   :  { %v533_v4 = vpop.trf.xlu0 }
 0x362   :  { %1134 = vmatmul.mubr.msk.f32.gmra.mxu1 %vm290_vm1, %v533_v4 }
 0x363   :  { %1136 = vmatprep.mubr.msk.f32.mxu1 %vm290_vm1, %v550_v44  ;;  %v565_v10 = vpop.trf.xlu1 }
 0x366   :  { %1137 = vmatmul.mubr.msk.f32.gmra.mxu1 %vm290_vm1, %v551_v46 }
 0x367   :  { %1139 = vmatprep.mubr.msk.f32.mxu1 %vm290_vm1, %v552_v49 }
 0x36a   :  { %1140 = vmatmul.mubr.msk.f32.gmra.mxu1 %vm290_vm1, %v553_v51 }
 0x36b   :  { %1142 = vmatprep.mubr.msk.f32.mxu1 %vm290_vm1, %v554_v54 }
 0x36e   :  { %1143 = vmatmul.mubr.msk.f32.gmra.mxu1 %vm290_vm1, %v555_v56 }
 0x36f   :  { %1145 = vmatprep.mubr.msk.f32.mxu1 %vm290_vm1, %v556_v59 }
 0x372   :  { %1146 = vmatmul.mubr.msk.f32.gmra.mxu1 %vm290_vm1, %v557_v61 }
 0x373   :  { %1148 = vmatprep.mubr.msk.f32.mxu1 %vm290_vm1, %v558_v0 }
 0x376   :  { %1149 = vmatmul.mubr.msk.f32.gmra.mxu1 %vm290_vm1, %v559_v2 }
 0x377   :  { %1151 = vmatprep.mubr.msk.f32.mxu1 %vm290_vm1, %v560_v5 }
 0x37a   :  { %1152 = vmatmul.mubr.msk.f32.gmra.mxu1 %vm290_vm1, %v561_v6 }
 0x37b   :  { %1154 = vmatprep.mubr.msk.f32.mxu1 %vm290_vm1, %v562_v7 }
 0x37e   :  { %1155 = vmatmul.mubr.msk.f32.gmra.mxu1 %vm290_vm1, %v563_v8 }
 0x37f   :  { %1157 = vmatprep.mubr.msk.f32.mxu1 %vm290_vm1, %v564_v9 }
 0x382   :  { %1158 = vmatmul.mubr.msk.f32.gmra.mxu1 %vm290_vm1, %v565_v10 }
 0x3ea   :  { %v1114_v12 = vpop.f32.mrf.mxu1 }
 0x3eb   :  { %v745_v13 = vadd.f32 %v1114_v12, %v1454_v11 }
 0x3ec   :  { %v739_v14 = vpop.f32.mrf.mxu1 }
 0x3ed   :  { %v899_v15 = vmax.f32 %v745_v13, 0.0  ;;  %v740_v16 = vadd.f32 %v1454_v11, %v739_v14 }
 0x3ef   :  { %932 = vst.msk [vmem:[%s1625_s9 + $0x8] sm:$0xff] %vm930_vm3, %v899_v15  ;;  %v898_v17 = vmax.f32 %v740_v16, 0.0 }
 0x3f1   :  { %931 = vst.msk [vmem:[%s1625_s9] sm:$0xff] %vm930_vm3, %v898_v17 }
 0x3f2   :  { %v1117_v18 = vpop.f32.mrf.mxu1 }
 0x3f3   :  { %v755_v19 = vadd.f32 %v1117_v18, %v1454_v11 }
 0x3f4   :  { %v749_v20 = vpop.f32.mrf.mxu1 }
 0x3f5   :  { %v901_v21 = vmax.f32 %v755_v19, 0.0  ;;  %v750_v22 = vadd.f32 %v1454_v11, %v749_v20 }
 0x3f7   :  { %934 = vst.msk [vmem:[%s1625_s9 + $0x18] sm:$0xff] %vm930_vm3, %v901_v21  ;;  %v900_v23 = vmax.f32 %v750_v22, 0.0 }
 0x3f9   :  { %933 = vst.msk [vmem:[%s1625_s9 + $0x10] sm:$0xff] %vm930_vm3, %v900_v23 }
 0x3fa   :  { %v1120_v24 = vpop.f32.mrf.mxu1 }
 0x3fb   :  { %v765_v25 = vadd.f32 %v1120_v24, %v1454_v11 }
 0x3fc   :  { %v759_v26 = vpop.f32.mrf.mxu1 }
 0x3fd   :  { %v903_v27 = vmax.f32 %v765_v25, 0.0  ;;  %v760_v28 = vadd.f32 %v1454_v11, %v759_v26 }
 0x3ff   :  { %936 = vst.msk [vmem:[%s1625_s9 + $0x28] sm:$0xff] %vm930_vm3, %v903_v27  ;;  %v902_v29 = vmax.f32 %v760_v28, 0.0 }
 0x401   :  { %935 = vst.msk [vmem:[%s1625_s9 + $0x20] sm:$0xff] %vm930_vm3, %v902_v29 }
 0x402   :  { %v1123_v30 = vpop.f32.mrf.mxu1 }
 0x403   :  { %v775_v31 = vadd.f32 %v1123_v30, %v1454_v11 }
 0x404   :  { %v769_v32 = vpop.f32.mrf.mxu1 }
 0x405   :  { %v905_v33 = vmax.f32 %v775_v31, 0.0  ;;  %v770_v34 = vadd.f32 %v1454_v11, %v769_v32 }
 0x407   :  { %938 = vst.msk [vmem:[%s1625_s9 + $0x38] sm:$0xff] %vm930_vm3, %v905_v33  ;;  %v904_v35 = vmax.f32 %v770_v34, 0.0 }
 0x409   :  { %937 = vst.msk [vmem:[%s1625_s9 + $0x30] sm:$0xff] %vm930_vm3, %v904_v35 }
 0x40a   :  { %v1126_v36 = vpop.f32.mrf.mxu1 }
 0x40b   :  { %v785_v37 = vadd.f32 %v1126_v36, %v1454_v11 }
 0x40c   :  { %v779_v38 = vpop.f32.mrf.mxu1 }
 0x40d   :  { %v907_v39 = vmax.f32 %v785_v37, 0.0  ;;  %v780_v40 = vadd.f32 %v1454_v11, %v779_v38 }
 0x40f   :  { %940 = vst.msk [vmem:[%s1625_s9 + $0x48] sm:$0xff] %vm930_vm3, %v907_v39  ;;  %v906_v41 = vmax.f32 %v780_v40, 0.0 }
 0x411   :  { %939 = vst.msk [vmem:[%s1625_s9 + $0x40] sm:$0xff] %vm930_vm3, %v906_v41 }
 0x412   :  { %v1129_v42 = vpop.f32.mrf.mxu1 }
 0x413   :  { %v795_v43 = vadd.f32 %v1129_v42, %v1454_v11 }
 0x414   :  { %v789_v44 = vpop.f32.mrf.mxu1 }
 0x415   :  { %v909_v45 = vmax.f32 %v795_v43, 0.0  ;;  %v790_v46 = vadd.f32 %v1454_v11, %v789_v44 }
 0x417   :  { %942 = vst.msk [vmem:[%s1625_s9 + $0x58] sm:$0xff] %vm930_vm3, %v909_v45  ;;  %v908_v47 = vmax.f32 %v790_v46, 0.0 }
 0x419   :  { %941 = vst.msk [vmem:[%s1625_s9 + $0x50] sm:$0xff] %vm930_vm3, %v908_v47 }
 0x41a   :  { %v1132_v48 = vpop.f32.mrf.mxu1 }
 0x41b   :  { %v805_v49 = vadd.f32 %v1132_v48, %v1454_v11 }
 0x41c   :  { %v799_v50 = vpop.f32.mrf.mxu1 }
 0x41d   :  { %v911_v51 = vmax.f32 %v805_v49, 0.0  ;;  %v800_v52 = vadd.f32 %v1454_v11, %v799_v50 }
 0x41f   :  { %944 = vst.msk [vmem:[%s1625_s9 + $0x68] sm:$0xff] %vm930_vm3, %v911_v51  ;;  %v910_v53 = vmax.f32 %v800_v52, 0.0 }
 0x421   :  { %943 = vst.msk [vmem:[%s1625_s9 + $0x60] sm:$0xff] %vm930_vm3, %v910_v53 }
 0x422   :  { %v1135_v54 = vpop.f32.mrf.mxu1 }
 0x423   :  { %v815_v55 = vadd.f32 %v1135_v54, %v1454_v11 }
 0x424   :  { %v809_v56 = vpop.f32.mrf.mxu1 }
 0x425   :  { %v913_v57 = vmax.f32 %v815_v55, 0.0  ;;  %v810_v58 = vadd.f32 %v1454_v11, %v809_v56 }
 0x426   :  { %v1138_v59 = vpop.f32.mrf.mxu1 }
 0x427   :  { %946 = vst.msk [vmem:[%s1625_s9 + $0x78] sm:$0xff] %vm930_vm3, %v913_v57  ;;  %v912_v60 = vmax.f32 %v810_v58, 0.0  ;;  %v825_v61 = vadd.f32 %v1138_v59, %v1454_v11 }
 0x428   :  { %v819_v62 = vpop.f32.mrf.mxu1 }
 0x429   :  { %945 = vst.msk [vmem:[%s1625_s9 + $0x70] sm:$0xff] %vm930_vm3, %v912_v60  ;;  %v915_v63 = vmax.f32 %v825_v61, 0.0  ;;  %v820_v0 = vadd.f32 %v1454_v11, %v819_v62 }
 0x42a   :  { %v1141_v1 = vpop.f32.mrf.mxu1 }
 0x42b   :  { %948 = vst.msk [vmem:[%s1625_s9 + $0x88] sm:$0xff] %vm930_vm3, %v915_v63  ;;  %v914_v2 = vmax.f32 %v820_v0, 0.0  ;;  %v835_v3 = vadd.f32 %v1141_v1, %v1454_v11 }
 0x42c   :  { %v829_v4 = vpop.f32.mrf.mxu1 }
 0x42d   :  { %947 = vst.msk [vmem:[%s1625_s9 + $0x80] sm:$0xff] %vm930_vm3, %v914_v2  ;;  %v917_v5 = vmax.f32 %v835_v3, 0.0  ;;  %v830_v6 = vadd.f32 %v1454_v11, %v829_v4 }
 0x42e   :  { %v1144_v7 = vpop.f32.mrf.mxu1 }
 0x42f   :  { %950 = vst.msk [vmem:[%s1625_s9 + $0x98] sm:$0xff] %vm930_vm3, %v917_v5  ;;  %v916_v8 = vmax.f32 %v830_v6, 0.0  ;;  %v845_v9 = vadd.f32 %v1144_v7, %v1454_v11 }
 0x430   :  { %v839_v10 = vpop.f32.mrf.mxu1 }
 0x431   :  { %949 = vst.msk [vmem:[%s1625_s9 + $0x90] sm:$0xff] %vm930_vm3, %v916_v8  ;;  %v919_v12 = vmax.f32 %v845_v9, 0.0  ;;  %v840_v13 = vadd.f32 %v1454_v11, %v839_v10 }
 0x432   :  { %v1147_v14 = vpop.f32.mrf.mxu1 }
 0x433   :  { %952 = vst.msk [vmem:[%s1625_s9 + $0xa8] sm:$0xff] %vm930_vm3, %v919_v12  ;;  %v918_v15 = vmax.f32 %v840_v13, 0.0  ;;  %v855_v16 = vadd.f32 %v1147_v14, %v1454_v11 }
 0x434   :  { %v849_v17 = vpop.f32.mrf.mxu1 }
 0x435   :  { %951 = vst.msk [vmem:[%s1625_s9 + $0xa0] sm:$0xff] %vm930_vm3, %v918_v15  ;;  %v921_v18 = vmax.f32 %v855_v16, 0.0  ;;  %v850_v19 = vadd.f32 %v1454_v11, %v849_v17 }
 0x436   :  { %v1150_v20 = vpop.f32.mrf.mxu1 }
 0x437   :  { %954 = vst.msk [vmem:[%s1625_s9 + $0xb8] sm:$0xff] %vm930_vm3, %v921_v18  ;;  %v920_v21 = vmax.f32 %v850_v19, 0.0  ;;  %v865_v22 = vadd.f32 %v1150_v20, %v1454_v11 }
 0x438   :  { %v859_v23 = vpop.f32.mrf.mxu1 }
 0x439   :  { %953 = vst.msk [vmem:[%s1625_s9 + $0xb0] sm:$0xff] %vm930_vm3, %v920_v21  ;;  %v923_v24 = vmax.f32 %v865_v22, 0.0  ;;  %v860_v25 = vadd.f32 %v1454_v11, %v859_v23 }
 0x43a   :  { %v1153_v26 = vpop.f32.mrf.mxu1 }
 0x43b   :  { %956 = vst.msk [vmem:[%s1625_s9 + $0xc8] sm:$0xff] %vm930_vm3, %v923_v24  ;;  %v922_v27 = vmax.f32 %v860_v25, 0.0  ;;  %v875_v28 = vadd.f32 %v1153_v26, %v1454_v11 }
 0x43c   :  { %v869_v29 = vpop.f32.mrf.mxu1 }
 0x43d   :  { %955 = vst.msk [vmem:[%s1625_s9 + $0xc0] sm:$0xff] %vm930_vm3, %v922_v27  ;;  %v925_v30 = vmax.f32 %v875_v28, 0.0  ;;  %v870_v31 = vadd.f32 %v1454_v11, %v869_v29 }
 0x43e   :  { %v1156_v32 = vpop.f32.mrf.mxu1 }
 0x43f   :  { %958 = vst.msk [vmem:[%s1625_s9 + $0xd8] sm:$0xff] %vm930_vm3, %v925_v30  ;;  %v924_v33 = vmax.f32 %v870_v31, 0.0  ;;  %v885_v34 = vadd.f32 %v1156_v32, %v1454_v11 }
 0x440   :  { %v879_v35 = vpop.f32.mrf.mxu1 }
 0x441   :  { %957 = vst.msk [vmem:[%s1625_s9 + $0xd0] sm:$0xff] %vm930_vm3, %v924_v33  ;;  %v927_v36 = vmax.f32 %v885_v34, 0.0  ;;  %v880_v37 = vadd.f32 %v1454_v11, %v879_v35 }
 0x442   :  { %v1159_v38 = vpop.f32.mrf.mxu1 }
 0x443   :  { %960 = vst.msk [vmem:[%s1625_s9 + $0xe8] sm:$0xff] %vm930_vm3, %v927_v36  ;;  %v926_v39 = vmax.f32 %v880_v37, 0.0  ;;  %v895_v40 = vadd.f32 %v1159_v38, %v1454_v11 }
 0x444   :  { %v889_v41 = vpop.f32.mrf.mxu1 }
 0x445   :  { %959 = vst.msk [vmem:[%s1625_s9 + $0xe0] sm:$0xff] %vm930_vm3, %v926_v39  ;;  %v929_v42 = vmax.f32 %v895_v40, 0.0  ;;  %v890_v43 = vadd.f32 %v1454_v11, %v889_v41 }
 0x447   :  { %962 = vst.msk [vmem:[%s1625_s9 + $0xf8] sm:$0xff] %vm930_vm3, %v929_v42  ;;  %v928_v44 = vmax.f32 %v890_v43, 0.0 }
 0x449   :  { %961 = vst.msk [vmem:[%s1625_s9 + $0xf0] sm:$0xff] %vm930_vm3, %v928_v44 }

</bundles_post_ra>
